<compile_context>
chip_gen: v7x
topology: tpu7x:2x2x1
jax: 0.10.0
libtpu: 0.0.40
codegen_flags: <defaults>
</compile_context>

<pallas_src>
import jax
import jax.numpy as jnp
from jax.experimental import pallas as pl
from jax.experimental.pallas import tpu as pltpu

NOISE_DIM = 5
HIDDEN = 128
OUT_DIM = 784
EPS = 1e-5  # torch BatchNorm1d default eps


def _vmem_limit_bytes():
    """Per-chip VMEM budget: ~3/4 of physical, capped at 100 MiB, floored at 32 MiB."""
    try:
        cap = int(pltpu.get_tpu_info().vmem_capacity_bytes)
    except Exception:
        cap = 64 * 1024 * 1024  # conservative fallback (v7x-sized)
    return max(32 * 1024 * 1024, min(cap * 3 // 4, 100 * 1024 * 1024))


def _default_batch_tile(B):
    if B <= 256:
        return B  # single block; block == full dim is always a legal tiling
    return 256    # cdiv grid; a partial last block is handled (masked stores)


def _linear_bn_relu(x_bf16, w_ref, g_ref, beta_ref):
    """bf16 matmul on MXU -> BatchNorm1d (training stats) -> ReLU (f32 VPU).

    Centered (two-pass) variance for numerical parity with PyTorch; the extra
    sweep over h is cheap relative to the MXU / writeback work elsewhere.
    Returns the activation in bf16, ready for the next MXU matmul.
    """
    h = jnp.dot(x_bf16, w_ref[...], preferred_element_type=jnp.float32)
    mean = jnp.mean(h, axis=0, keepdims=True)                 # [1, d]
    hc = h - mean
    var = jnp.mean(hc * hc, axis=0, keepdims=True)            # biased batch var
    scale = g_ref[...] * jax.lax.rsqrt(var + EPS)             # EUP rsqrt
    h = jnp.maximum(hc * scale + beta_ref[...], 0.0)          # fused FMA + ReLU
    return h.astype(jnp.bfloat16)


def gen_hidden_kernel(noise_ref,
                      w1_ref, g1_ref, be1_ref,
                      w2_ref, g2_ref, be2_ref,
                      w3_ref, g3_ref, be3_ref,
                      h_ref):
    """Layers 1-3 (whole batch resident: BN stats span the full batch)."""
    x = noise_ref[...].astype(jnp.bfloat16)
    x = _linear_bn_relu(x, w1_ref, g1_ref, be1_ref)
    x = _linear_bn_relu(x, w2_ref, g2_ref, be2_ref)
    x = _linear_bn_relu(x, w3_ref, g3_ref, be3_ref)
    h_ref[...] = x


def gen_output_kernel(h_ref, w4_ref, b4_ref, out_ref):
    """Layer 4 (per batch tile): matmul + bias + sigmoid + store."""
    logits = jnp.dot(h_ref[...], w4_ref[...],
                     preferred_element_type=jnp.float32) + b4_ref[...]
    out_ref[...] = jax.nn.sigmoid(logits).astype(out_ref.dtype)


def init_params(key):
    """Deterministic parameter init (PyTorch-like uniform fan-in for Linear).

    Weights are stored pre-transposed [in, out] in bf16; BN gamma/beta and the
    final bias stay f32.  Linear biases of the three BN layers are omitted
    (BatchNorm cancels them exactly).  No padding is stored — W4 keeps its true
    (384, 784) shape.
    """
    dims = [(NOISE_DIM, HIDDEN), (HIDDEN, 2 * HIDDEN),
            (2 * HIDDEN, 3 * HIDDEN), (3 * HIDDEN, OUT_DIM)]
    params = []
    for i, (din, dout) in enumerate(dims):
        key, kw, kb = jax.random.split(key, 3)
        bound = 1.0 / (din ** 0.5)
        w = jax.random.uniform(kw, (din, dout), jnp.float32, -bound, bound)
        params.append(w.astype(jnp.bfloat16))
        if i < 3:  # BatchNorm affine params
            params.append(jnp.ones((1, dout), jnp.float32))    # gamma
            params.append(jnp.zeros((1, dout), jnp.float32))   # beta
        else:      # final Linear keeps its bias (no BN after it)
            params.append(jax.random.uniform(kb, (1, dout), jnp.float32,
                                             -bound, bound))
    return params


def generator_forward(noise, params, *, out_dtype=jnp.float32, batch_tile=None):
    """Forward pass.  noise: (B, 5) f32.  Returns (B, 784) in `out_dtype`.

    B should be a multiple of 256 (v6e/v7x) or 128 (v5e), and at least a
    multiple of 16 (bf16 sublane packing); B >= 512 engages both v7x cores.
    Pass out_dtype=jnp.bfloat16 on v6e/v7x to halve the HBM writeback when the
    kernel is writeback-bound at large B.
    """
    (w1, g1, be1, w2, g2, be2, w3, g3, be3, w4, b4) = params
    B = noise.shape[0]
    vmem = _vmem_limit_bytes()
    H3 = 3 * HIDDEN

    # --- Call A: layers 1-3, whole batch resident (BN needs full-batch stats).
    h3 = pl.pallas_call(
        gen_hidden_kernel,
        out_shape=jax.ShapeDtypeStruct((B, H3), jnp.bfloat16),
        in_specs=[pl.BlockSpec(memory_space=pltpu.MemorySpace.VMEM)] * 10,
        out_specs=pl.BlockSpec(memory_space=pltpu.MemorySpace.VMEM),
        compiler_params=pltpu.CompilerParams(vmem_limit_bytes=vmem),
    )(noise, w1, g1, be1, w2, g2, be2, w3, g3, be3)

    # --- Call B: layer 4, gridded over batch tiles.
    #   * "parallel" grid axis -> batch tiles split across v7x's two TCs.
    #   * BlockSpec pipelining overlaps output writeback with the next tile.
    #   * W4/b4 block indices are constant -> fetched once, not re-streamed.
    tb = batch_tile if batch_tile is not None else _default_batch_tile(B)
    out = pl.pallas_call(
        gen_output_kernel,
        out_shape=jax.ShapeDtypeStruct((B, OUT_DIM), out_dtype),
        grid=(pl.cdiv(B, tb),),
        in_specs=[
            pl.BlockSpec((tb, H3), lambda i: (i, 0)),
            pl.BlockSpec((H3, OUT_DIM), lambda i: (0, 0)),
            pl.BlockSpec((1, OUT_DIM), lambda i: (0, 0)),
        ],
        out_specs=pl.BlockSpec((tb, OUT_DIM), lambda i: (i, 0)),
        compiler_params=pltpu.CompilerParams(
            dimension_semantics=("parallel",),
            vmem_limit_bytes=vmem),
    )(h3, w4, b4)
    return out


if __name__ == "__main__":
    key = jax.random.PRNGKey(0)
    kp, kn = jax.random.split(key)
    params = init_params(kp)

    # Small example batch; multiple of 16 for bf16 sublane packing.
    # Production: multiples of 256 (v6e/v7x) / 128 (v5e), >=512 for dual-TC v7x.
    batch = 16
    noise = jax.random.normal(kn, (batch, NOISE_DIM), jnp.float32)

    out = generator_forward(noise, params)
    out = jax.block_until_ready(out)
    assert out.shape == (batch, OUT_DIM)
    assert out.dtype == jnp.float32
    assert bool(jnp.all(jnp.isfinite(out)))
    assert bool(jnp.all((out >= 0.0) & (out <= 1.0)))
    print("KERNEL_OK")
</pallas_src>

<mosaic_0001>
module attributes {stable_mosaic.version = 11 : i64} {
  func.func @gen_hidden_kernel(%arg0: memref<16x5xf32, #tpu.memory_space<vmem>>, %arg1: memref<5x128xbf16, #tpu.memory_space<vmem>>, %arg2: memref<1x128xf32, #tpu.memory_space<vmem>>, %arg3: memref<1x128xf32, #tpu.memory_space<vmem>>, %arg4: memref<128x256xbf16, #tpu.memory_space<vmem>>, %arg5: memref<1x256xf32, #tpu.memory_space<vmem>>, %arg6: memref<1x256xf32, #tpu.memory_space<vmem>>, %arg7: memref<256x384xbf16, #tpu.memory_space<vmem>>, %arg8: memref<1x384xf32, #tpu.memory_space<vmem>>, %arg9: memref<1x384xf32, #tpu.memory_space<vmem>>, %arg10: memref<16x384xbf16, #tpu.memory_space<vmem>>) attributes {dimension_semantics = [], scalar_prefetch = 0 : i64, scratch_operands = 0 : i64, tpu.core_type = #tpu.core_type<tc>} {
    %c0 = arith.constant 0 : index
    %c0_0 = arith.constant 0 : index
    %0 = vector.load %arg0[%c0, %c0_0] : memref<16x5xf32, #tpu.memory_space<vmem>>, vector<16x5xf32>
    %1 = arith.truncf %0 : vector<16x5xf32> to vector<16x5xbf16>
    %c0_1 = arith.constant 0 : index
    %c0_2 = arith.constant 0 : index
    %2 = vector.load %arg1[%c0_1, %c0_2] : memref<5x128xbf16, #tpu.memory_space<vmem>>, vector<5x128xbf16>
    %cst = arith.constant dense<0.000000e+00> : vector<16x128xf32>
    %3 = tpu.matmul %1, %2, %cst {dimension_numbers = #tpu.dot_dimension_numbers<[1], [0], [0], [1], [0, 0, 1, 1], [], []>} : vector<16x5xbf16>, vector<5x128xbf16>, vector<16x128xf32> -> vector<16x128xf32>
    %cst_3 = arith.constant dense<0.000000e+00> : vector<128xf32>
    %4 = vector.multi_reduction <add>, %3, %cst_3 [0] : vector<16x128xf32> to vector<128xf32>
    %5 = vector.shape_cast %4 : vector<128xf32> to vector<1x128xf32>
    %cst_4 = arith.constant 1.600000e+01 : f32
    %6 = vector.broadcast %cst_4 : f32 to vector<1x128xf32>
    %7 = arith.divf %5, %6 : vector<1x128xf32>
    %8 = vector.broadcast %7 : vector<1x128xf32> to vector<16x128xf32>
    %9 = arith.subf %3, %8 : vector<16x128xf32>
    %10 = arith.mulf %9, %9 : vector<16x128xf32>
    %cst_5 = arith.constant dense<0.000000e+00> : vector<128xf32>
    %11 = vector.multi_reduction <add>, %10, %cst_5 [0] : vector<16x128xf32> to vector<128xf32>
    %12 = vector.shape_cast %11 : vector<128xf32> to vector<1x128xf32>
    %cst_6 = arith.constant 1.600000e+01 : f32
    %13 = vector.broadcast %cst_6 : f32 to vector<1x128xf32>
    %14 = arith.divf %12, %13 : vector<1x128xf32>
    %c0_7 = arith.constant 0 : index
    %c0_8 = arith.constant 0 : index
    %15 = vector.load %arg2[%c0_7, %c0_8] : memref<1x128xf32, #tpu.memory_space<vmem>>, vector<1x128xf32>
    %cst_9 = arith.constant 9.99999974E-6 : f32
    %16 = vector.broadcast %cst_9 : f32 to vector<1x128xf32>
    %17 = arith.addf %14, %16 : vector<1x128xf32>
    %18 = math.rsqrt %17 : vector<1x128xf32>
    %19 = arith.mulf %15, %18 : vector<1x128xf32>
    %20 = vector.broadcast %19 : vector<1x128xf32> to vector<16x128xf32>
    %21 = arith.mulf %9, %20 : vector<16x128xf32>
    %c0_10 = arith.constant 0 : index
    %c0_11 = arith.constant 0 : index
    %22 = vector.load %arg3[%c0_10, %c0_11] : memref<1x128xf32, #tpu.memory_space<vmem>>, vector<1x128xf32>
    %23 = vector.broadcast %22 : vector<1x128xf32> to vector<16x128xf32>
    %24 = arith.addf %21, %23 : vector<16x128xf32>
    %cst_12 = arith.constant 0.000000e+00 : f32
    %25 = vector.broadcast %cst_12 : f32 to vector<16x128xf32>
    %26 = arith.maximumf %24, %25 : vector<16x128xf32>
    %27 = arith.truncf %26 : vector<16x128xf32> to vector<16x128xbf16>
    %c0_13 = arith.constant 0 : index
    %c0_14 = arith.constant 0 : index
    %28 = vector.load %arg4[%c0_13, %c0_14] : memref<128x256xbf16, #tpu.memory_space<vmem>>, vector<128x256xbf16>
    %cst_15 = arith.constant dense<0.000000e+00> : vector<16x256xf32>
    %29 = tpu.matmul %27, %28, %cst_15 {dimension_numbers = #tpu.dot_dimension_numbers<[1], [0], [0], [1], [0, 0, 1, 1], [], []>} : vector<16x128xbf16>, vector<128x256xbf16>, vector<16x256xf32> -> vector<16x256xf32>
    %cst_16 = arith.constant dense<0.000000e+00> : vector<256xf32>
    %30 = vector.multi_reduction <add>, %29, %cst_16 [0] : vector<16x256xf32> to vector<256xf32>
    %31 = vector.shape_cast %30 : vector<256xf32> to vector<1x256xf32>
    %cst_17 = arith.constant 1.600000e+01 : f32
    %32 = vector.broadcast %cst_17 : f32 to vector<1x256xf32>
    %33 = arith.divf %31, %32 : vector<1x256xf32>
    %34 = vector.broadcast %33 : vector<1x256xf32> to vector<16x256xf32>
    %35 = arith.subf %29, %34 : vector<16x256xf32>
    %36 = arith.mulf %35, %35 : vector<16x256xf32>
    %cst_18 = arith.constant dense<0.000000e+00> : vector<256xf32>
    %37 = vector.multi_reduction <add>, %36, %cst_18 [0] : vector<16x256xf32> to vector<256xf32>
    %38 = vector.shape_cast %37 : vector<256xf32> to vector<1x256xf32>
    %cst_19 = arith.constant 1.600000e+01 : f32
    %39 = vector.broadcast %cst_19 : f32 to vector<1x256xf32>
    %40 = arith.divf %38, %39 : vector<1x256xf32>
    %c0_20 = arith.constant 0 : index
    %c0_21 = arith.constant 0 : index
    %41 = vector.load %arg5[%c0_20, %c0_21] : memref<1x256xf32, #tpu.memory_space<vmem>>, vector<1x256xf32>
    %cst_22 = arith.constant 9.99999974E-6 : f32
    %42 = vector.broadcast %cst_22 : f32 to vector<1x256xf32>
    %43 = arith.addf %40, %42 : vector<1x256xf32>
    %44 = math.rsqrt %43 : vector<1x256xf32>
    %45 = arith.mulf %41, %44 : vector<1x256xf32>
    %46 = vector.broadcast %45 : vector<1x256xf32> to vector<16x256xf32>
    %47 = arith.mulf %35, %46 : vector<16x256xf32>
    %c0_23 = arith.constant 0 : index
    %c0_24 = arith.constant 0 : index
    %48 = vector.load %arg6[%c0_23, %c0_24] : memref<1x256xf32, #tpu.memory_space<vmem>>, vector<1x256xf32>
    %49 = vector.broadcast %48 : vector<1x256xf32> to vector<16x256xf32>
    %50 = arith.addf %47, %49 : vector<16x256xf32>
    %cst_25 = arith.constant 0.000000e+00 : f32
    %51 = vector.broadcast %cst_25 : f32 to vector<16x256xf32>
    %52 = arith.maximumf %50, %51 : vector<16x256xf32>
    %53 = arith.truncf %52 : vector<16x256xf32> to vector<16x256xbf16>
    %c0_26 = arith.constant 0 : index
    %c0_27 = arith.constant 0 : index
    %54 = vector.load %arg7[%c0_26, %c0_27] : memref<256x384xbf16, #tpu.memory_space<vmem>>, vector<256x384xbf16>
    %cst_28 = arith.constant dense<0.000000e+00> : vector<16x384xf32>
    %55 = tpu.matmul %53, %54, %cst_28 {dimension_numbers = #tpu.dot_dimension_numbers<[1], [0], [0], [1], [0, 0, 1, 1], [], []>} : vector<16x256xbf16>, vector<256x384xbf16>, vector<16x384xf32> -> vector<16x384xf32>
    %cst_29 = arith.constant dense<0.000000e+00> : vector<384xf32>
    %56 = vector.multi_reduction <add>, %55, %cst_29 [0] : vector<16x384xf32> to vector<384xf32>
    %57 = vector.shape_cast %56 : vector<384xf32> to vector<1x384xf32>
    %cst_30 = arith.constant 1.600000e+01 : f32
    %58 = vector.broadcast %cst_30 : f32 to vector<1x384xf32>
    %59 = arith.divf %57, %58 : vector<1x384xf32>
    %60 = vector.broadcast %59 : vector<1x384xf32> to vector<16x384xf32>
    %61 = arith.subf %55, %60 : vector<16x384xf32>
    %62 = arith.mulf %61, %61 : vector<16x384xf32>
    %cst_31 = arith.constant dense<0.000000e+00> : vector<384xf32>
    %63 = vector.multi_reduction <add>, %62, %cst_31 [0] : vector<16x384xf32> to vector<384xf32>
    %64 = vector.shape_cast %63 : vector<384xf32> to vector<1x384xf32>
    %cst_32 = arith.constant 1.600000e+01 : f32
    %65 = vector.broadcast %cst_32 : f32 to vector<1x384xf32>
    %66 = arith.divf %64, %65 : vector<1x384xf32>
    %c0_33 = arith.constant 0 : index
    %c0_34 = arith.constant 0 : index
    %67 = vector.load %arg8[%c0_33, %c0_34] : memref<1x384xf32, #tpu.memory_space<vmem>>, vector<1x384xf32>
    %cst_35 = arith.constant 9.99999974E-6 : f32
    %68 = vector.broadcast %cst_35 : f32 to vector<1x384xf32>
    %69 = arith.addf %66, %68 : vector<1x384xf32>
    %70 = math.rsqrt %69 : vector<1x384xf32>
    %71 = arith.mulf %67, %70 : vector<1x384xf32>
    %72 = vector.broadcast %71 : vector<1x384xf32> to vector<16x384xf32>
    %73 = arith.mulf %61, %72 : vector<16x384xf32>
    %c0_36 = arith.constant 0 : index
    %c0_37 = arith.constant 0 : index
    %74 = vector.load %arg9[%c0_36, %c0_37] : memref<1x384xf32, #tpu.memory_space<vmem>>, vector<1x384xf32>
    %75 = vector.broadcast %74 : vector<1x384xf32> to vector<16x384xf32>
    %76 = arith.addf %73, %75 : vector<16x384xf32>
    %cst_38 = arith.constant 0.000000e+00 : f32
    %77 = vector.broadcast %cst_38 : f32 to vector<16x384xf32>
    %78 = arith.maximumf %76, %77 : vector<16x384xf32>
    %79 = arith.truncf %78 : vector<16x384xf32> to vector<16x384xbf16>
    %c0_39 = arith.constant 0 : index
    %c0_40 = arith.constant 0 : index
    %80 = vector.load %arg10[%c0_39, %c0_40] : memref<16x384xbf16, #tpu.memory_space<vmem>>, vector<16x384xbf16>
    tpu.vector_store %arg10[%c0_39, %c0_40], %79 {strides = array<i32>} : memref<16x384xbf16, #tpu.memory_space<vmem>>, vector<16x384xbf16>,
    return
  }
}

</mosaic_0001>

<bundles_post_ra>
// kernel: tpu_custom_call.1
= control target key start
LH: loop header
LB: loop body
LE: loop exit
PB: predicated region body
PF: predicated region fallthrough
CT: control target
= control target key end

     0   :  { %15 = vsyncpa [#allocation3], 0  ;;  %s1463_s0 = inlined_call_operand.vmem [shape: f32[16,5], index: 0, kind: input, shape index: {}]   ;;  %s1464_s1 = inlined_call_operand.vmem [shape: bf16[5,128], index: 1, kind: input, shape index: {}]   ;;  %s1465_s2 = inlined_call_operand.vmem [shape: f32[1,128], index: 2, kind: input, shape index: {}]   ;;  %s1466_s3 = inlined_call_operand.vmem [shape: f32[1,128], index: 3, kind: input, shape index: {}]   ;;  %s1467_s4 = inlined_call_operand.hbm [shape: bf16[128,256], index: 4, kind: input, shape index: {}]   ;;  %s1468_s5 = inlined_call_operand.vmem [shape: f32[1,256], index: 5, kind: input, shape index: {}]   ;;  %s1469_s6 = inlined_call_operand.vmem [shape: f32[1,256], index: 6, kind: input, shape index: {}]   ;;  %s1470_s7 = inlined_call_operand.hbm [shape: bf16[256,384], index: 7, kind: input, shape index: {}]   ;;  %s1471_s8 = inlined_call_operand.vmem [shape: f32[1,384], index: 8, kind: input, shape index: {}]   ;;  %s1472_s9 = inlined_call_operand.vmem [shape: f32[1,384], index: 9, kind: input, shape index: {}]   ;;  %s1473_s10 = inlined_call_operand.hbm [shape: bf16[16,384], index: 10, kind: output, shape index: {}]  }
   0x1   :  { %16 = vsyncpa [#allocation6], 0 }
   0x2   :  { %17 = vsyncpa [#allocation4], 0  ;;  %s1286_s13 = smov [#allocation2]   ;;  %s1214_s17 = scalar_lea.hbm %s1467_s4, 2048 }
   0x3   :  { %s31_s14 = sshll.u32 %s1286_s13, 4  ;;  %p1215_p0 = scmp.ne.s32.totalorder %s1467_s4, %s1214_s17  ;;  %s32_s14 = int_to_ptr.vmem [resolvable:$true] %s31_s14 }
   0x4   :  { %p1218_p1 = scmp.lt.u32.totalorder %s1214_s17, %s1467_s4 }
   0x6   :  { %p1220_p2 = pnand %p1218_p1, %p1215_p0 }
   0x8   :  { %1223 = shalt.err (!%p1220_p2)
}
   0x9   :  { %s1224_s22 = scalar_lea.vmem %s32_s14, 2048  ;;  %p1229_p4 = scmp.lt.s32.totalorder %s32_s14, %s32_s14 }
   0xa   :  { %p1225_p3 = scmp.ne.s32.totalorder %s32_s14, %s1224_s22  ;;  %p1230_p5 = scmp.lt.s32.totalorder %s1224_s22, %s1224_s22 }
   0xc   :  { %p1231_p6 = por %p1230_p5, %p1229_p4 }
   0xe   :  { %p1232_p7 = pnand %p1231_p6, %p1225_p3 }
  0x10   :  { %1235 = shalt.err (!%p1232_p7)
}
  0x11   :  { %s1287_s23 = smov 128   ;;  %s1288_s24 = smov 8  }
  0x12   :  { %37 = dma.hbm_to_vmem [thread:$0]  %s1467_s4, 2048, %s32_s14, [#allocation3], %s1287_s23, %s1287_s23, %s1288_s24  }
  0x13   :  { %s1289_s27 = smov [#allocation5]   ;;  %s1236_s11 = scalar_lea.hbm %s1470_s7, 6144 }
  0x14   :  { %s47_s28 = sshll.u32 %s1289_s27, 4  ;;  %p1237_p8 = scmp.ne.s32.totalorder %s1470_s7, %s1236_s11  ;;  %s48_s28 = int_to_ptr.vmem [resolvable:$true] %s47_s28 }
  0x15   :  { %p1240_p9 = scmp.lt.u32.totalorder %s1236_s11, %s1470_s7 }
  0x17   :  { %p1242_p10 = pnand %p1240_p9, %p1237_p8 }
  0x19   :  { %1245 = shalt.err (!%p1242_p10)
}
  0x1a   :  { %s1246_s17 = scalar_lea.vmem %s48_s28, 6144  ;;  %p1251_p12 = scmp.lt.s32.totalorder %s48_s28, %s48_s28 }
  0x1b   :  { %p1247_p11 = scmp.ne.s32.totalorder %s48_s28, %s1246_s17  ;;  %p1252_p13 = scmp.lt.s32.totalorder %s1246_s17, %s1246_s17 }
  0x1d   :  { %p1253_p0 = por %p1252_p13, %p1251_p12 }
  0x1f   :  { %p1254_p1 = pnand %p1253_p0, %p1247_p11 }
  0x21   :  { %1257 = shalt.err (!%p1254_p1)
}
  0x22   :  { %s1290_s4 = smov 192   ;;  %s1291_s14 = smov 12  }
  0x23   :  { %53 = dma.hbm_to_vmem [thread:$0]  %s1470_s7, 6144, %s48_s28, [#allocation6], %s1290_s4, %s1290_s4, %s1291_s14  }
  0x24   :  { %1280 = dma.done.wait [#allocation3], 2048  }
  0x25   :  { %1281 = vsyncadd [#allocation3], 4294965248 }
  0x26   :  { %1282 = dma.done.wait [#allocation6], 6144  }
  0x27   :  { %1283 = vsyncadd [#allocation6], 4294961152  ;;  %vm73_vm0 = vcmask 1041408   ;;  %v1292_v0 = vmov 0.0   ;;  %vm74_vm1 = vcmask 1042432   ;;  %v1293_v1 = vmov 65535  }
  0x28   :  { %1096 = vmatprep.subr.bf16.mxu0 %v1292_v0  ;;  %v75_v2 = vsel %vm73_vm0, 4294967295, %v1293_v1  ;;  %vm1294_vm2 = vmmov 0   ;;  %v68_v4 = vld [vmem:[%s1464_s1] sm:$0x7]  ;;  %v66_v6 = vld [vmem:[%s1463_s0 + $0x8] sm:$0xff]  ;;  %vm69_vm3 = vcmask 39936   ;;  %v147_v51 = vlaneseq }
  0x29   :  { %1098 = vmatprep.mubr.msk.bf16.mxu0 %vm1294_vm2, %v1292_v0  ;;  %v76_v3 = vsel %vm74_vm1, %v75_v2, 0  ;;  %v65_v5 = vld [vmem:[%s1463_s0] sm:$0xff]  ;;  %v1114_v9 = vld [vmem:[#allocation2 + $0x4] ss:$8 sps:$4 sm:$0xff]   ;;  %v1116_v10 = vld [vmem:[#allocation2] ss:$8 sps:$4 sm:$0xff]  }
  0x2a   :  { %v78_v7 = vand.u32 %v76_v3, %v68_v4  ;;  %v67_v8 = vpack.c.bf16 %v66_v6, %v65_v5  ;;  %262 = vmatprep.subr.bf16.mxu1 %v1114_v9  ;;  %v1117_v11 = vld [vmem:[#allocation2 + $0x14] ss:$8 sps:$4 sm:$0xff]   ;;  %v1119_v12 = vld [vmem:[#allocation2 + $0x10] ss:$8 sps:$4 sm:$0xff]   ;;  %v1120_v13 = vld [vmem:[#allocation2 + $0x24] ss:$8 sps:$4 sm:$0xff]  }
  0x2b   :  { %263 = vmatpush1.bf16.msra.mxu1 %v1116_v10  ;;  %v1122_v14 = vld [vmem:[#allocation2 + $0x20] ss:$8 sps:$4 sm:$0xff]   ;;  %v1123_v15 = vld [vmem:[#allocation2 + $0x34] ss:$8 sps:$4 sm:$0xff]   ;;  %v1125_v16 = vld [vmem:[#allocation2 + $0x30] ss:$8 sps:$4 sm:$0xff]  }
  0x2c   :  { %1097 = vmatpush3.bf16.msra.mxu0 %v78_v7  ;;  %264 = vmatprep.subr.bf16.mxu1 %v1117_v11  ;;  %v1126_v17 = vld [vmem:[#allocation2 + $0x44] ss:$8 sps:$4 sm:$0xff]   ;;  %v1128_v18 = vld [vmem:[#allocation2 + $0x40] ss:$8 sps:$4 sm:$0xff]   ;;  %v1129_v19 = vld [vmem:[#allocation2 + $0x54] ss:$8 sps:$4 sm:$0xff]  }
  0x2d   :  { %v1131_v20 = vld [vmem:[#allocation2 + $0x50] ss:$8 sps:$4 sm:$0xff]   ;;  %v1132_v21 = vld [vmem:[#allocation2 + $0x64] ss:$8 sps:$4 sm:$0xff]   ;;  %v1134_v22 = vld [vmem:[#allocation2 + $0x60] ss:$8 sps:$4 sm:$0xff]  }
  0x2e   :  { %v1135_v23 = vld [vmem:[#allocation2 + $0x74] ss:$8 sps:$4 sm:$0xff]   ;;  %v1137_v24 = vld [vmem:[#allocation2 + $0x70] ss:$8 sps:$4 sm:$0xff]   ;;  %v1295_v25 = vmov 0   ;;  %v1389_v52 = vshrl.u32 %v147_v51, 7 }
  0x2f   :  { %1099 = vmatmul.mubr.msk.bf16.vlgmr.msra.gmra.mrb[0].mxu0 %vm69_vm3, %v67_v8  ;;  %265 = vmatpush1.bf16.msra.mxu1 %v1119_v12  ;;  %v142_v53 = vld [vmem:[%s1465_s2] sm:$0x1]  ;;  %v1138_v3 = vld [vmem:[#allocation5] ss:$12 sps:$4 sm:$0xff]   ;;  %v1143_v4 = vld [vmem:[#allocation5 + $0x1c] ss:$12 sps:$4 sm:$0xff]  }
  0x30   :  { %266 = vmatprep.subr.bf16.mxu1 %v1120_v13  ;;  %294 = vmatprep.mubr.bf16.mxu1 %v1295_v25  ;;  %v1395_v54 = vsub.s32 0, %v1389_v52  ;;  %v999_v58 = vld [vmem:[%s1466_s3] ss:$0 sm:$0xff]  ;;  %v1141_v5 = vld [vmem:[#allocation5 + $0x18] ss:$12 sps:$4 sm:$0xff]  }
  0x31   :  { %v1140_v2 = vld [vmem:[#allocation5 + $0x4] ss:$12 sps:$4 sm:$0xff]   ;;  %v1146_v6 = vld [vmem:[#allocation5 + $0x34] ss:$12 sps:$4 sm:$0xff]   ;;  %v1149_v8 = vld [vmem:[#allocation5 + $0x4c] ss:$12 sps:$4 sm:$0xff]  }
  0x32   :  { %726 = vmatprep.subr.bf16.mxu0 %v1140_v2  ;;  %v1144_v7 = vld [vmem:[#allocation5 + $0x30] ss:$12 sps:$4 sm:$0xff]   ;;  %v1147_v9 = vld [vmem:[#allocation5 + $0x48] ss:$12 sps:$4 sm:$0xff]   ;;  %v1150_v11 = vld [vmem:[#allocation5 + $0x60] ss:$12 sps:$4 sm:$0xff]  }
  0x33   :  { %267 = vmatpush1.bf16.msra.mxu1 %v1122_v14  ;;  %727 = vmatpush1.bf16.msra.mxu0 %v1138_v3  ;;  %v1152_v10 = vld [vmem:[#allocation5 + $0x64] ss:$12 sps:$4 sm:$0xff]   ;;  %v1155_v12 = vld [vmem:[#allocation5 + $0x7c] ss:$12 sps:$4 sm:$0xff]   ;;  %v1158_v14 = vld [vmem:[#allocation5 + $0x94] ss:$12 sps:$4 sm:$0xff]  }
  0x34   :  { %268 = vmatprep.subr.bf16.mxu1 %v1123_v15  ;;  %728 = vmatprep.subr.bf16.mxu0 %v1143_v4  ;;  %v1153_v13 = vld [vmem:[#allocation5 + $0x78] ss:$12 sps:$4 sm:$0xff]   ;;  %v1156_v15 = vld [vmem:[#allocation5 + $0x90] ss:$12 sps:$4 sm:$0xff]   ;;  %v1171_v25 = vld [vmem:[#allocation5 + $0x20] ss:$12 sps:$4 sm:$0xff]  }
  0x37   :  { %269 = vmatpush1.bf16.msra.mxu1 %v1125_v16  ;;  %729 = vmatpush1.bf16.msra.mxu0 %v1141_v5  ;;  %v1161_v16 = vld [vmem:[#allocation5 + $0xac] ss:$12 sps:$4 sm:$0xff]  }
  0x38   :  { %270 = vmatprep.subr.bf16.mxu1 %v1126_v17  ;;  %730 = vmatprep.subr.bf16.mxu0 %v1146_v6  ;;  %v1159_v17 = vld [vmem:[#allocation5 + $0xa8] ss:$12 sps:$4 sm:$0xff]  }
  0x3b   :  { %271 = vmatpush1.bf16.msra.mxu1 %v1128_v18  ;;  %731 = vmatpush1.bf16.msra.mxu0 %v1144_v7  ;;  %v1164_v18 = vld [vmem:[#allocation5 + $0xc4] ss:$12 sps:$4 sm:$0xff]  }
  0x3c   :  { %272 = vmatprep.subr.bf16.mxu1 %v1129_v19  ;;  %732 = vmatprep.subr.bf16.mxu0 %v1149_v8  ;;  %v1165_v19 = vld [vmem:[#allocation5 + $0xc8] ss:$12 sps:$4 sm:$0xff]  }
  0x3f   :  { %273 = vmatpush1.bf16.msra.mxu1 %v1131_v20  ;;  %733 = vmatpush1.bf16.msra.mxu0 %v1147_v9  ;;  %v1162_v20 = vld [vmem:[#allocation5 + $0xc0] ss:$12 sps:$4 sm:$0xff]  }
  0x40   :  { %274 = vmatprep.subr.bf16.mxu1 %v1132_v21  ;;  %734 = vmatprep.subr.bf16.mxu0 %v1152_v10  ;;  %v1166_v21 = vld [vmem:[#allocation5 + $0x8] ss:$12 sps:$4 sm:$0xff]  }
  0x43   :  { %275 = vmatpush1.bf16.msra.mxu1 %v1134_v22  ;;  %735 = vmatpush1.bf16.msra.mxu0 %v1150_v11  ;;  %v1169_v22 = vld [vmem:[#allocation5 + $0xdc] ss:$12 sps:$4 sm:$0xff]  }
  0x44   :  { %276 = vmatprep.subr.bf16.mxu1 %v1135_v23  ;;  %736 = vmatprep.subr.bf16.mxu0 %v1155_v12  ;;  %v1170_v23 = vld [vmem:[#allocation5 + $0xe0] ss:$12 sps:$4 sm:$0xff]  }
  0x47   :  { %277 = vmatpush1.bf16.msra.mxu1 %v1137_v24  ;;  %737 = vmatpush1.bf16.msra.mxu0 %v1153_v13  ;;  %v1167_v24 = vld [vmem:[#allocation5 + $0xd8] ss:$12 sps:$4 sm:$0xff]  }
  0x48   :  { %738 = vmatprep.subr.bf16.mxu0 %v1158_v14  ;;  %1074 = vmatprep.subr.bf16.mxu1 %v1165_v19 }
  0x4b   :  { %739 = vmatpush1.bf16.msra.mxu0 %v1156_v15 }
  0x4c   :  { %740 = vmatprep.subr.bf16.mxu0 %v1161_v16 }
  0x4f   :  { %741 = vmatpush1.bf16.msra.mxu0 %v1159_v17 }
  0x50   :  { %742 = vmatprep.subr.bf16.mxu0 %v1164_v18 }
  0x53   :  { %743 = vmatpush1.bf16.msra.mxu0 %v1162_v20 }
  0x54   :  { %744 = vmatprep.subr.bf16.mxu0 %v1169_v22 }
  0x57   :  { %745 = vmatpush1.bf16.msra.mxu0 %v1167_v24 }
 0x102   :  { %v114_v26 = vpop.f32.mrb[0].mxu0 }
 0x103   :  { %v1100_v27 = vpop.f32.mrb[1].mxu0 }
 0x104   :  { %v117_v28 = vpop.f32.mrb[2].mxu0  ;;  %v1175_v27 = vld [vmem:[#allocation5 + $0xf8] ss:$12 sps:$4 sm:$0xff]  }
 0x105   :  { %v121_v29 = vadd.f32 %v117_v28, %v114_v26  ;;  %v1101_v30 = vpop.f32.mrb[3].mxu0 }
 0x106   :  { %v1179_v30 = vld [vmem:[#allocation5 + $0x10c] ss:$12 sps:$4 sm:$0xff]  }
 0x107   :  { %v122_v31 = vrot.slane %v121_v29, 4 }
 0x109   :  { %v123_v32 = vadd.f32 %v122_v31, %v121_v29  ;;  %v1176_v29 = vld [vmem:[#allocation5 + $0x38] ss:$12 sps:$4 sm:$0xff]   ;;  %v1180_v31 = vld [vmem:[#allocation5 + $0x110] ss:$12 sps:$4 sm:$0xff]  }
 0x10b   :  { %v124_v33 = vrot.slane %v123_v32, 2 }
 0x10d   :  { %v125_v34 = vadd.f32 %v124_v33, %v123_v32  ;;  %v1177_v32 = vld [vmem:[#allocation5 + $0x108] ss:$12 sps:$4 sm:$0xff]   ;;  %v1181_v33 = vld [vmem:[#allocation5 + $0x50] ss:$12 sps:$4 sm:$0xff]  }
 0x10f   :  { %v126_v35 = vrot.slane %v125_v34, 1 }
 0x111   :  { %v127_v36 = vadd.f32 %v126_v35, %v125_v34  ;;  %v1184_v34 = vld [vmem:[#allocation5 + $0x124] ss:$12 sps:$4 sm:$0xff]   ;;  %v1185_v35 = vld [vmem:[#allocation5 + $0x128] ss:$12 sps:$4 sm:$0xff]  }
 0x113   :  { %v129_v37 = vmul.f32 0.0625, %v127_v36  ;;  %v1182_v36 = vld [vmem:[#allocation5 + $0x120] ss:$12 sps:$4 sm:$0xff]  }
 0x115   :  { %v130_v38 = vsub.f32 %v114_v26, %v129_v37  ;;  %v131_v39 = vsub.f32 %v117_v28, %v129_v37  ;;  %v1174_v26 = vld [vmem:[#allocation5 + $0xf4] ss:$12 sps:$4 sm:$0xff]   ;;  %v1172_v28 = vld [vmem:[#allocation5 + $0xf0] ss:$12 sps:$4 sm:$0xff]  }
 0x116   :  { %746 = vmatprep.subr.bf16.mxu0 %v1174_v26  ;;  %v1186_v37 = vld [vmem:[#allocation5 + $0x68] ss:$12 sps:$4 sm:$0xff]  }
 0x117   :  { %v132_v40 = vmul.f32 %v130_v38, %v130_v38  ;;  %v133_v41 = vmul.f32 %v131_v39, %v131_v39  ;;  %747 = vmatpush1.bf16.msra.mxu0 %v1172_v28 }
 0x118   :  { %748 = vmatprep.subr.bf16.mxu0 %v1179_v30 }
 0x119   :  { %v134_v42 = vadd.f32 %v133_v41, %v132_v40  ;;  %v1187_v40 = vld [vmem:[#allocation5 + $0x138] ss:$12 sps:$4 sm:$0xff]   ;;  %v1191_v41 = vld [vmem:[#allocation5 + $0x80] ss:$12 sps:$4 sm:$0xff]  }
 0x11b   :  { %v135_v43 = vrot.slane %v134_v42, 4  ;;  %749 = vmatpush1.bf16.msra.mxu0 %v1177_v32 }
 0x11c   :  { %750 = vmatprep.subr.bf16.mxu0 %v1184_v34  ;;  %v1296_v34 = vmov 1966171168  }
 0x11d   :  { %v136_v44 = vadd.f32 %v135_v43, %v134_v42  ;;  %v1194_v42 = vld [vmem:[#allocation5 + $0x154] ss:$12 sps:$4 sm:$0xff]   ;;  %v1195_v43 = vld [vmem:[#allocation5 + $0x158] ss:$12 sps:$4 sm:$0xff]  }
 0x11f   :  { %v137_v45 = vrot.slane %v136_v44, 2  ;;  %751 = vmatpush1.bf16.msra.mxu0 %v1182_v36 }
 0x121   :  { %v138_v46 = vadd.f32 %v137_v45, %v136_v44  ;;  %v1192_v44 = vld [vmem:[#allocation5 + $0x150] ss:$12 sps:$4 sm:$0xff]   ;;  %v1196_v45 = vld [vmem:[#allocation5 + $0x98] ss:$12 sps:$4 sm:$0xff]  }
 0x123   :  { %v139_v47 = vrot.slane %v138_v46, 1 }
 0x125   :  { %v140_v48 = vadd.f32 %v139_v47, %v138_v46  ;;  %v1197_v46 = vld [vmem:[#allocation5 + $0x168] ss:$12 sps:$4 sm:$0xff]   ;;  %v1199_v47 = vld [vmem:[#allocation5 + $0x16c] ss:$12 sps:$4 sm:$0xff]  }
 0x127   :  { %v141_v49 = vmul.f32 0.0625, %v140_v48  ;;  %v1200_v48 = vld [vmem:[#allocation5 + $0x170] ss:$12 sps:$4 sm:$0xff]  }
 0x129   :  { %v143_v50 = vadd.f32 1e-05, %v141_v49  ;;  %v1201_v49 = vld [vmem:[#allocation5 + $0xb0] ss:$12 sps:$4 sm:$0xff]  }
 0x12b   :  { %1202 = vrsqrt.f32 %v143_v50 }
 0x135   :  { %v1203_v55 = vpop.eup %1202 }
 0x136   :  { %v145_v56 = vmul.f32 %v1203_v55, %v142_v53 }
 0x138   :  { %v150_v57 = vrot.slane %v145_v56, %v1395_v54 }
 0x13a   :  { %v152_v59 = vmul.f32 %v150_v57, %v130_v38  ;;  %v153_v60 = vmul.f32 %v150_v57, %v131_v39  ;;  %v1189_v38 = vld [vmem:[#allocation5 + $0x13c] ss:$12 sps:$4 sm:$0xff]   ;;  %v1190_v39 = vld [vmem:[#allocation5 + $0x140] ss:$12 sps:$4 sm:$0xff]  }
 0x13b   :  { %752 = vmatprep.subr.bf16.mxu0 %v1189_v38 }
 0x13c   :  { %v162_v61 = vadd.f32 %v999_v58, %v153_v60  ;;  %v161_v62 = vadd.f32 %v999_v58, %v152_v59  ;;  %753 = vmatpush1.bf16.msra.mxu0 %v1187_v40 }
 0x13d   :  { %754 = vmatprep.subr.bf16.mxu0 %v1194_v42  ;;  %v345_v42 = vld [vmem:[%s1468_s5] sm:$0x3] }
 0x13e   :  { %v163_v63 = vmax.f32 %v161_v62, 0.0  ;;  %v164_v0 = vmax.f32 %v162_v61, 0.0 }
 0x140   :  { %v165_v1 = vpack.c.bf16 %v164_v0, %v163_v63  ;;  %755 = vmatpush1.bf16.msra.mxu0 %v1192_v44  ;;  %v1410_v44 = vsub.s32 1, %v1389_v52 }
 0x141   :  { %756 = vmatprep.subr.bf16.mxu0 %v1199_v47 }
 0x142   :  { %295 = vmatmul.mubr.bf16.vlgmr.msra.gmra.mrb[0].mxu1 %v165_v1 }
 0x143   :  { %1075 = vmatpush3.bf16.msra.mxu1 %v1166_v21 }
 0x144   :  { %1076 = vmatprep.subr.bf16.mxu1 %v1170_v23  ;;  %757 = vmatpush1.bf16.msra.mxu0 %v1197_v46 }
 0x147   :  { %1077 = vmatpush3.bf16.msra.mxu1 %v1171_v25 }
 0x148   :  { %1078 = vmatprep.subr.bf16.mxu1 %v1175_v27 }
 0x14b   :  { %1079 = vmatpush3.bf16.msra.mxu1 %v1176_v29 }
 0x14c   :  { %1080 = vmatprep.subr.bf16.mxu1 %v1180_v31 }
 0x14f   :  { %1081 = vmatpush3.bf16.msra.mxu1 %v1181_v33 }
 0x150   :  { %1082 = vmatprep.subr.bf16.mxu1 %v1185_v35  ;;  %v354_v35 = vunpack.c.l.s4 %v1296_v34 }
 0x152   :  { %v355_v36 = vunpack.c.0.s8 %v354_v35 }
 0x153   :  { %1083 = vmatpush3.bf16.msra.mxu1 %v1186_v37 }
 0x154   :  { %1084 = vmatprep.subr.bf16.mxu1 %v1190_v39  ;;  %v1402_v38 = vsub.s32 %v355_v36, %v1389_v52 }
 0x157   :  { %1085 = vmatpush3.bf16.msra.mxu1 %v1191_v41 }
 0x158   :  { %1086 = vmatprep.subr.bf16.mxu1 %v1195_v43 }
 0x15b   :  { %1087 = vmatpush3.bf16.msra.mxu1 %v1196_v45  ;;  %v384_v45 = vld [vmem:[%s1469_s6] sm:$0x3] }
 0x15c   :  { %1088 = vmatprep.subr.bf16.mxu1 %v1200_v48 }
 0x15f   :  { %1089 = vmatpush3.bf16.msra.mxu1 %v1201_v49  ;;  %v389_v49 = vrot.slane %v384_v45, %v1395_v54 }
 0x215   :  { %v296_v50 = vpop.f32.mrb[0].mxu1 }
 0x216   :  { %v298_v51 = vpop.f32.mrb[1].mxu1 }
 0x217   :  { %v300_v53 = vpop.f32.mrb[2].mxu1 }
 0x218   :  { %v305_v55 = vadd.f32 %v300_v53, %v296_v50  ;;  %v302_v56 = vpop.f32.mrb[3].mxu1 }
 0x219   :  { %v312_v57 = vadd.f32 %v302_v56, %v298_v51 }
 0x21a   :  { %v306_v58 = vrot.slane %v305_v55, 4 }
 0x21b   :  { %v313_v59 = vrot.slane %v312_v57, 4 }
 0x21c   :  { %v307_v60 = vadd.f32 %v306_v58, %v305_v55 }
 0x21d   :  { %v314_v61 = vadd.f32 %v313_v59, %v312_v57 }
 0x21e   :  { %v308_v62 = vrot.slane %v307_v60, 2 }
 0x21f   :  { %v315_v63 = vrot.slane %v314_v61, 2 }
 0x220   :  { %v309_v0 = vadd.f32 %v308_v62, %v307_v60 }
 0x221   :  { %v316_v1 = vadd.f32 %v315_v63, %v314_v61 }
 0x222   :  { %v310_v2 = vrot.slane %v309_v0, 1 }
 0x223   :  { %v317_v3 = vrot.slane %v316_v1, 1 }
 0x224   :  { %v311_v4 = vadd.f32 %v310_v2, %v309_v0 }
 0x225   :  { %v318_v5 = vadd.f32 %v317_v3, %v316_v1 }
 0x226   :  { %v319_v6 = vmul.f32 0.0625, %v311_v4 }
 0x227   :  { %v320_v7 = vmul.f32 0.0625, %v318_v5 }
 0x228   :  { %v321_v8 = vsub.f32 %v296_v50, %v319_v6  ;;  %v323_v9 = vsub.f32 %v300_v53, %v319_v6  ;;  %v393_v50 = vrot.slane %v384_v45, %v1410_v44 }
 0x229   :  { %v322_v10 = vsub.f32 %v298_v51, %v320_v7  ;;  %v324_v11 = vsub.f32 %v302_v56, %v320_v7 }
 0x22a   :  { %v325_v12 = vmul.f32 %v321_v8, %v321_v8  ;;  %v327_v13 = vmul.f32 %v323_v9, %v323_v9 }
 0x22b   :  { %v326_v14 = vmul.f32 %v322_v10, %v322_v10  ;;  %v328_v15 = vmul.f32 %v324_v11, %v324_v11 }
 0x22c   :  { %v329_v16 = vadd.f32 %v327_v13, %v325_v12 }
 0x22d   :  { %v336_v17 = vadd.f32 %v328_v15, %v326_v14 }
 0x22e   :  { %v330_v18 = vrot.slane %v329_v16, 4 }
 0x22f   :  { %v337_v19 = vrot.slane %v336_v17, 4 }
 0x230   :  { %v331_v20 = vadd.f32 %v330_v18, %v329_v16 }
 0x231   :  { %v338_v21 = vadd.f32 %v337_v19, %v336_v17 }
 0x232   :  { %v332_v22 = vrot.slane %v331_v20, 2 }
 0x233   :  { %v339_v23 = vrot.slane %v338_v21, 2 }
 0x234   :  { %v333_v24 = vadd.f32 %v332_v22, %v331_v20 }
 0x235   :  { %v340_v25 = vadd.f32 %v339_v23, %v338_v21 }
 0x236   :  { %v334_v26 = vrot.slane %v333_v24, 1 }
 0x237   :  { %v341_v27 = vrot.slane %v340_v25, 1 }
 0x238   :  { %v335_v28 = vadd.f32 %v334_v26, %v333_v24 }
 0x239   :  { %v342_v29 = vadd.f32 %v341_v27, %v340_v25 }
 0x23a   :  { %v343_v30 = vmul.f32 0.0625, %v335_v28 }
 0x23b   :  { %v344_v31 = vmul.f32 0.0625, %v342_v29 }
 0x23c   :  { %v346_v32 = vadd.f32 1e-05, %v343_v30 }
 0x23d   :  { %v347_v33 = vadd.f32 1e-05, %v344_v31 }
 0x23e   :  { %1204 = vrsqrt.f32 %v346_v32 }
 0x23f   :  { %1206 = vrsqrt.f32 %v347_v33 }
 0x248   :  { %v1205_v37 = vpop.eup %1204 }
 0x249   :  { %v1207_v39 = vpop.eup %1206 }
 0x24a   :  { %v352_v40 = vcombine.low %v1205_v37, %v1207_v39 }
 0x24c   :  { %v359_v41 = vrot.slane %v352_v40, %v1402_v38 }
 0x24e   :  { %v366_v43 = vrot.slane %v359_v41, %v1402_v38 }
 0x250   :  { %v368_v46 = vmul.f32 %v366_v43, %v345_v42 }
 0x252   :  { %v373_v47 = vrot.slane %v368_v46, %v1395_v54  ;;  %v377_v48 = vrot.slane %v368_v46, %v1410_v44 }
 0x254   :  { %v380_v51 = vmul.f32 %v373_v47, %v321_v8  ;;  %v381_v53 = vmul.f32 %v377_v48, %v322_v10  ;;  %v382_v55 = vmul.f32 %v373_v47, %v323_v9  ;;  %v383_v56 = vmul.f32 %v377_v48, %v324_v11 }
 0x256   :  { %v399_v57 = vadd.f32 %v393_v50, %v383_v56  ;;  %v397_v58 = vadd.f32 %v393_v50, %v381_v53  ;;  %v396_v59 = vadd.f32 %v389_v49, %v380_v51  ;;  %v398_v60 = vadd.f32 %v389_v49, %v382_v55 }
 0x258   :  { %v401_v61 = vmax.f32 %v397_v58, 0.0  ;;  %v403_v62 = vmax.f32 %v399_v57, 0.0  ;;  %v400_v63 = vmax.f32 %v396_v59, 0.0  ;;  %v402_v0 = vmax.f32 %v398_v60, 0.0 }
 0x25a   :  { %v405_v1 = vpack.c.bf16 %v403_v62, %v401_v61  ;;  %v404_v2 = vpack.c.bf16 %v402_v0, %v400_v63 }
 0x25c   :  { %758 = vmatprep.mubr.bf16.mxu0 %v405_v1  ;;  %801 = vmatprep.mubr.bf16.mxu1 %v405_v1 }
 0x25d   :  { %759 = vmatmul.mubr.bf16.vlgmr.msra.gmra.mrb[4].mxu0 %v404_v2  ;;  %802 = vmatmul.mubr.bf16.vlgmr.msra.gmra.mrb[4].mxu1 %v404_v2 }
 0x330   :  { %v760_v3 = vpop.f32.mrb[4].mxu0  ;;  %v1090_v4 = vpop.f32.mrb[4].mxu1 }
 0x331   :  { %v762_v5 = vpop.f32.mrb[5].mxu0  ;;  %v1091_v6 = vpop.f32.mrb[5].mxu1 }
 0x332   :  { %v1092_v7 = vadd.f32 %v1091_v6, %v1090_v4  ;;  %v764_v8 = vpop.f32.mrb[6].mxu0  ;;  %v1093_v9 = vpop.f32.mrb[6].mxu1 }
 0x333   :  { %v810_v10 = vadd.f32 %v764_v8, %v760_v3  ;;  %v766_v11 = vpop.f32.mrb[7].mxu0  ;;  %v1094_v12 = vpop.f32.mrb[7].mxu1 }
 0x334   :  { %v817_v13 = vadd.f32 %v766_v11, %v762_v5  ;;  %v1095_v14 = vadd.f32 %v1094_v12, %v1093_v9 }
 0x335   :  { %v811_v15 = vrot.slane %v810_v10, 4 }
 0x336   :  { %v818_v16 = vrot.slane %v817_v13, 4  ;;  %v824_v17 = vadd.f32 %v1095_v14, %v1092_v7 }
 0x337   :  { %v812_v18 = vadd.f32 %v811_v15, %v810_v10 }
 0x338   :  { %v819_v19 = vadd.f32 %v818_v16, %v817_v13  ;;  %v825_v20 = vrot.slane %v824_v17, 4 }
 0x339   :  { %v813_v21 = vrot.slane %v812_v18, 2 }
 0x33a   :  { %v820_v22 = vrot.slane %v819_v19, 2  ;;  %v826_v23 = vadd.f32 %v825_v20, %v824_v17 }
 0x33b   :  { %v814_v24 = vadd.f32 %v813_v21, %v812_v18 }
 0x33c   :  { %v821_v25 = vadd.f32 %v820_v22, %v819_v19  ;;  %v827_v26 = vrot.slane %v826_v23, 2 }
 0x33d   :  { %v815_v27 = vrot.slane %v814_v24, 1 }
 0x33e   :  { %v822_v28 = vrot.slane %v821_v25, 1  ;;  %v828_v29 = vadd.f32 %v827_v26, %v826_v23  ;;  %v870_v23 = vld [vmem:[%s1471_s8] sm:$0x7]  ;;  %s1297_s8 = smov [#allocation7]  }
 0x33f   :  { %v816_v30 = vadd.f32 %v815_v27, %v814_v24  ;;  %v927_v26 = vld [vmem:[%s1472_s9] sm:$0x7]  ;;  %s985_s9 = sshll.u32 %s1297_s8, 4  ;;  %s986_s9 = int_to_ptr.vmem [resolvable:$true] %s985_s9 }
 0x340   :  { %v823_v31 = vadd.f32 %v822_v28, %v821_v25  ;;  %v829_v32 = vrot.slane %v828_v29, 1  ;;  %v916_v25 = vsub.s32 2, %v1389_v52  ;;  %v932_v28 = vrot.slane %v927_v26, %v1395_v54  ;;  %s1258_s11 = scalar_lea.vmem %s986_s9, 384  ;;  %p1263_p3 = scmp.lt.s32.totalorder %s986_s9, %s986_s9 }
 0x341   :  { %v831_v33 = vmul.f32 0.0625, %v816_v30  ;;  %p1259_p2 = scmp.ne.s32.totalorder %s986_s9, %s1258_s11  ;;  %p1264_p4 = scmp.lt.s32.totalorder %s1258_s11, %s1258_s11 }
 0x342   :  { %v832_v34 = vmul.f32 0.0625, %v823_v31  ;;  %v830_v35 = vadd.f32 %v829_v32, %v828_v29  ;;  %v936_v29 = vrot.slane %v927_v26, %v1410_v44 }
 0x343   :  { %v1419_v36 = vsub.f32 %v760_v3, %v831_v33  ;;  %v1421_v37 = vsub.f32 %v764_v8, %v831_v33  ;;  %v940_v33 = vrot.slane %v927_v26, %v916_v25  ;;  %p1265_p5 = por %p1264_p4, %p1263_p3 }
 0x344   :  { %v835_v39 = vsub.f32 %v762_v5, %v832_v34  ;;  %v1423_v40 = vsub.f32 %v766_v11, %v832_v34  ;;  %v833_v41 = vmul.f32 0.0625, %v830_v35 }
 0x345   :  { %v840_v42 = vmul.f32 %v1419_v36, %v1419_v36  ;;  %v843_v43 = vmul.f32 %v1421_v37, %v1421_v37  ;;  %p1266_p6 = pnand %p1265_p5, %p1259_p2 }
 0x346   :  { %v841_v45 = vmul.f32 %v835_v39, %v835_v39  ;;  %v844_v46 = vmul.f32 %v1423_v40, %v1423_v40  ;;  %v836_v47 = vsub.f32 %v1092_v7, %v833_v41  ;;  %v839_v48 = vsub.f32 %v1095_v14, %v833_v41 }
 0x347   :  { %v846_v49 = vadd.f32 %v843_v43, %v840_v42 }
 0x348   :  { %v853_v50 = vadd.f32 %v844_v46, %v841_v45  ;;  %v842_v51 = vmul.f32 %v836_v47, %v836_v47  ;;  %v845_v53 = vmul.f32 %v839_v48, %v839_v48 }
 0x349   :  { %v847_v55 = vrot.slane %v846_v49, 4 }
 0x34a   :  { %v854_v56 = vrot.slane %v853_v50, 4  ;;  %v860_v57 = vadd.f32 %v845_v53, %v842_v51 }
 0x34b   :  { %v848_v58 = vadd.f32 %v847_v55, %v846_v49 }
 0x34c   :  { %v855_v59 = vadd.f32 %v854_v56, %v853_v50  ;;  %v861_v60 = vrot.slane %v860_v57, 4 }
 0x34d   :  { %v849_v61 = vrot.slane %v848_v58, 2 }
 0x34e   :  { %v856_v62 = vrot.slane %v855_v59, 2  ;;  %v862_v63 = vadd.f32 %v861_v60, %v860_v57 }
 0x34f   :  { %v850_v0 = vadd.f32 %v849_v61, %v848_v58 }
 0x350   :  { %v857_v1 = vadd.f32 %v856_v62, %v855_v59  ;;  %v863_v2 = vrot.slane %v862_v63, 2 }
 0x351   :  { %v851_v3 = vrot.slane %v850_v0, 1 }
 0x352   :  { %v858_v4 = vrot.slane %v857_v1, 1  ;;  %v864_v5 = vadd.f32 %v863_v2, %v862_v63 }
 0x353   :  { %v852_v6 = vadd.f32 %v851_v3, %v850_v0 }
 0x354   :  { %v859_v7 = vadd.f32 %v858_v4, %v857_v1  ;;  %v865_v8 = vrot.slane %v864_v5, 1 }
 0x355   :  { %v867_v9 = vmul.f32 0.0625, %v852_v6 }
 0x356   :  { %v868_v10 = vmul.f32 0.0625, %v859_v7  ;;  %v866_v11 = vadd.f32 %v865_v8, %v864_v5 }
 0x357   :  { %v871_v12 = vadd.f32 1e-05, %v867_v9 }
 0x358   :  { %v872_v13 = vadd.f32 1e-05, %v868_v10  ;;  %v869_v14 = vmul.f32 0.0625, %v866_v11 }
 0x359   :  { %1208 = vrsqrt.f32 %v871_v12 }
 0x35a   :  { %1210 = vrsqrt.f32 %v872_v13  ;;  %v873_v15 = vadd.f32 1e-05, %v869_v14 }
 0x35c   :  { %1212 = vrsqrt.f32 %v873_v15 }
 0x363   :  { %v1209_v16 = vpop.eup %1208 }
 0x364   :  { %v1211_v17 = vpop.eup %1210 }
 0x365   :  { %v880_v18 = vcombine.low %v1209_v16, %v1211_v17 }
 0x366   :  { %v1213_v19 = vpop.eup %1212 }
 0x367   :  { %v887_v20 = vrot.slane %v880_v18, %v1402_v38  ;;  %v894_v21 = vrot.slane %v1213_v19, %v1402_v38 }
 0x369   :  { %v895_v22 = vcombine.low %v887_v20, %v894_v21 }
 0x36b   :  { %v902_v24 = vrot.slane %v895_v22, %v1402_v38 }
 0x36d   :  { %v904_v27 = vmul.f32 %v902_v24, %v870_v23 }
 0x36f   :  { %v909_v30 = vrot.slane %v904_v27, %v1395_v54  ;;  %v913_v31 = vrot.slane %v904_v27, %v1410_v44  ;;  %v917_v32 = vrot.slane %v904_v27, %v916_v25 }
 0x371   :  { %v923_v34 = vmul.f32 %v917_v32, %v836_v47  ;;  %v926_v35 = vmul.f32 %v917_v32, %v839_v48  ;;  %v921_v38 = vmul.f32 %v909_v30, %v1419_v36  ;;  %v922_v52 = vmul.f32 %v913_v31, %v835_v39 }
 0x372   :  { %v924_v41 = vmul.f32 %v909_v30, %v1421_v37  ;;  %v925_v42 = vmul.f32 %v913_v31, %v1423_v40 }
 0x373   :  { %v946_v43 = vadd.f32 %v940_v33, %v923_v34  ;;  %v949_v45 = vadd.f32 %v940_v33, %v926_v35  ;;  %v944_v46 = vadd.f32 %v932_v28, %v921_v38  ;;  %v945_v49 = vadd.f32 %v936_v29, %v922_v52 }
 0x374   :  { %v947_v50 = vadd.f32 %v932_v28, %v924_v41  ;;  %v948_v51 = vadd.f32 %v936_v29, %v925_v42 }
 0x375   :  { %v955_v54 = vmax.f32 %v949_v45, 0.0  ;;  %v950_v53 = vmax.f32 %v944_v46, 0.0  ;;  %v951_v44 = vmax.f32 %v945_v49, 0.0  ;;  %v952_v55 = vmax.f32 %v946_v43, 0.0 }
 0x376   :  { %v953_v47 = vmax.f32 %v947_v50, 0.0  ;;  %v954_v48 = vmax.f32 %v948_v51, 0.0 }
 0x377   :  { %v1071_v36 = vpack.c.bf16 %v955_v54, %v955_v54  ;;  %v1068_v39 = vpack.c.bf16 %v951_v44, %v950_v53  ;;  %v1069_v56 = vpack.c.bf16 %v952_v55, %v952_v55 }
 0x378   :  { %v1070_v37 = vpack.c.bf16 %v954_v48, %v953_v47 }
 0x379   :  { %979 = vst [vmem:[#allocation7 + $0x14] sm:$0xf] %v1071_v36  ;;  %976 = vst [vmem:[#allocation7] sm:$0xff] %v1068_v39 }
 0x37a   :  { %977 = vst [vmem:[#allocation7 + $0x8] sm:$0xf] %v1069_v56  ;;  %978 = vst [vmem:[#allocation7 + $0xc] sm:$0xff] %v1070_v37 }
 0x37b   :  { %1269 = shalt.err (!%p1266_p6)
}
 0x37c   :  { %s1270_s15 = scalar_lea.hbm %s1473_s10, 384 }
 0x37d   :  { %p1271_p7 = scmp.ne.s32.totalorder %s1473_s10, %s1270_s15  ;;  %p1274_p8 = scmp.lt.u32.totalorder %s1270_s15, %s1473_s10 }
 0x37f   :  { %p1276_p9 = pnand %p1274_p8, %p1271_p7 }
 0x381   :  { %1279 = shalt.err (!%p1276_p9)
}
 0x382   :  { %991 = dma.vmem_to_hbm [thread:$0]  %s986_s9, 384, %s1473_s10, [#allocation4], %s1290_s4, %s1290_s4, %s1291_s14  }
 0x383   :  { %1284 = dma.done.wait [#allocation4], 384  }
 0x384   :  { %1285 = vsyncadd [#allocation4], 4294966912 }
 0x385   :  { %995 = vsyncpa [#allocation3], 1 }
 0x386   :  { %996 = vsyncpa [#allocation6], 1 }
 0x387   :  { %997 = vsyncpa [#allocation4], 1 }

</bundles_post_ra>
